<compile_context>
chip_gen: v5e
topology: v5e:2x2
jax: 0.10.0
libtpu: 0.0.40
codegen_flags: <defaults>
</compile_context>

<pallas_src>
import functools

import jax
import jax.numpy as jnp
from jax.experimental import pallas as pl
from jax.experimental.pallas import tpu as pltpu


def mlp_kernel(x_ref, w1_ref, b1_ref, w2_ref, b2_ref, o_ref):
    # In-kernel cast of the streamed f32 tile to bf16 (no separate HBM pass).
    x = x_ref[...].astype(jnp.bfloat16)
    # Layer 1: [tile_b, 784](bf16) @ [784, 128](bf16) -> f32 accumulation.
    h = jnp.dot(x, w1_ref[...], preferred_element_type=jnp.float32)
    h = jnp.maximum(h + b1_ref[...], 0.0)          # f32 bias add + ReLU
    # Layer 2 (lane-dense, zero-padded to 128 cols):
    # [tile_b, 128](bf16) @ [128, 128](bf16) -> f32 accumulation.
    y = jnp.dot(h.astype(jnp.bfloat16), w2_ref[...],
                preferred_element_type=jnp.float32)
    # f32 bias add, then bf16 store (unmasked 128-wide lane-dense vst).
    o_ref[...] = (y + b2_ref[...]).astype(o_ref.dtype)


def _round_up(n, m):
    return ((n + m - 1) // m) * m


@functools.partial(jax.jit, static_argnames=("tile_b",))
def mlp_forward(x, w1, b1, w2, b2, *, tile_b=1024):
    """x: [B, 784] f32; w1: [784, 128]; b1: [128]; w2: [128, 10]; b2: [10]."""
    B, K = x.shape                       # K = 784 (streamed unpadded)
    H = w1.shape[1]                      # 128
    out_dim = w2.shape[1]                # 10
    n_pad = 128                          # lane-dense output width

    # Adaptive tile: don't blow an 8-row batch up to 1024 rows.
    tile_b = min(tile_b, _round_up(B, 16))
    grid = (pl.cdiv(B, tile_b),)

    # One-time, tiny weight prep (VMEM-resident in the kernel, so padding /
    # casting these costs nothing per batch row).
    w1_b = w1.astype(jnp.bfloat16)                                   # [784,128]
    b1_r = b1.astype(jnp.float32).reshape(1, H)                      # [1,128]
    w2_p = jnp.zeros((H, n_pad), jnp.bfloat16).at[:, :out_dim].set(
        w2.astype(jnp.bfloat16))                                     # [128,128]
    b2_p = jnp.zeros((1, n_pad), jnp.float32).at[:, :out_dim].set(
        b2.astype(jnp.float32))                                      # [1,128]

    out = pl.pallas_call(
        mlp_kernel,
        out_shape=jax.ShapeDtypeStruct((B, n_pad), jnp.bfloat16),
        grid=grid,
        in_specs=[
            # x: tiled along batch, double-buffered by the pipeline.
            # Last dim = full 784 (no K padding of the streamed operand).
            pl.BlockSpec((tile_b, K), lambda i: (i, 0)),
            # Weights / biases: constant index_map -> stay VMEM-resident,
            # DMA'd once.
            pl.BlockSpec((K, H), lambda i: (0, 0)),
            pl.BlockSpec((1, H), lambda i: (0, 0)),
            pl.BlockSpec((H, n_pad), lambda i: (0, 0)),
            pl.BlockSpec((1, n_pad), lambda i: (0, 0)),
        ],
        out_specs=pl.BlockSpec((tile_b, n_pad), lambda i: (i, 0)),
        compiler_params=pltpu.CompilerParams(
            # Batch axis is embarrassingly parallel -> megacore (v7x: 2 TCs).
            dimension_semantics=("parallel",),
            # Headroom so tile_b up to ~2048 with f32 x also fits on v5e's
            # small default scoped-VMEM limit (safe on v6e/v7x too).
            vmem_limit_bytes=32 * 1024 * 1024,
        ),
        cost_estimate=pl.CostEstimate(
            flops=2 * B * (K * H + H * n_pad),
            transcendentals=0,
            bytes_accessed=(B * K * 4            # x (f32, streamed once)
                            + w1_b.size * 2 + w2_p.size * 2
                            + b1_r.size * 4 + b2_p.size * 4
                            + B * n_pad * 2),    # bf16 output writeback
        ),
    )(x, w1_b, b1_r, w2_p, b2_p)

    # Tiny: slice the 10 real logits and return f32 (matches the torch module's
    # output dtype).  The padded [B,128] bf16 buffer is never materialized
    # beyond this point.
    return out[:, :out_dim].astype(jnp.float32)


def init_params(key):
    # Deterministic init mimicking nn.Linear's U(-1/sqrt(fan_in), 1/sqrt(fan_in)).
    k1, k2, k3, k4 = jax.random.split(key, 4)
    lim1 = 1.0 / jnp.sqrt(784.0)
    lim2 = 1.0 / jnp.sqrt(128.0)
    # Stored as [in, out] (transposed vs. torch's [out, in]).
    w1 = jax.random.uniform(k1, (784, 128), jnp.float32, -lim1, lim1)
    b1 = jax.random.uniform(k2, (128,), jnp.float32, -lim1, lim1)
    w2 = jax.random.uniform(k3, (128, 10), jnp.float32, -lim2, lim2)
    b2 = jax.random.uniform(k4, (10,), jnp.float32, -lim2, lim2)
    return w1, b1, w2, b2


if __name__ == "__main__":
    key = jax.random.PRNGKey(0)
    kx, kp = jax.random.split(key)

    B = 8  # small batch -> adaptive tile_b = 16, single grid step
    x = jax.random.normal(kx, (B, 784), jnp.float32)
    w1, b1, w2, b2 = init_params(kp)

    out = mlp_forward(x, w1, b1, w2, b2)
    out = jax.block_until_ready(out)
    assert out.shape == (B, 10)

    # Reference with matching bf16 input/weight rounding (f32 accumulation).
    xb = x.astype(jnp.bfloat16)
    w1b = w1.astype(jnp.bfloat16)
    w2b = w2.astype(jnp.bfloat16)
    h_ref = jnp.maximum(
        jnp.dot(xb, w1b, preferred_element_type=jnp.float32) + b1, 0.0)
    ref_bf16 = jnp.dot(h_ref.astype(jnp.bfloat16), w2b,
                       preferred_element_type=jnp.float32) + b2
    # Slightly looser tol than before: the kernel stores the result as bf16.
    assert jnp.allclose(out, ref_bf16, atol=1e-2, rtol=1e-2)

    # Sanity check against the full-f32 reference (bf16 cast tolerance).
    ref_f32 = jnp.maximum(x @ w1 + b1, 0.0) @ w2 + b2
    assert jnp.allclose(out, ref_f32, atol=5e-2, rtol=5e-2)

    print("KERNEL_OK")
</pallas_src>

<mosaic_0001>
module attributes {stable_mosaic.version = 11 : i64} {
  func.func @mlp_kernel(%arg0: i32, %arg1: memref<16x784xf32, #tpu.memory_space<vmem>>, %arg2: memref<784x128xbf16, #tpu.memory_space<vmem>>, %arg3: memref<1x128xf32, #tpu.memory_space<vmem>>, %arg4: memref<128x128xbf16, #tpu.memory_space<vmem>>, %arg5: memref<1x128xf32, #tpu.memory_space<vmem>>, %arg6: memref<16x128xbf16, #tpu.memory_space<vmem>>) attributes {dimension_semantics = [#tpu.dimension_semantics<parallel>], iteration_bounds = array<i64: 1>, scalar_prefetch = 0 : i64, scratch_operands = 0 : i64, tpu.core_type = #tpu.core_type<tc>, window_params = [{transform_indices = @transform_0, window_bounds = array<i64: 16, 784>}, {pipeline_mode = #tpu.pipeline_mode<synchronous>, transform_indices = @transform_1, window_bounds = array<i64: 784, 128>}, {pipeline_mode = #tpu.pipeline_mode<synchronous>, transform_indices = @transform_2, window_bounds = array<i64: 1, 128>}, {pipeline_mode = #tpu.pipeline_mode<synchronous>, transform_indices = @transform_3, window_bounds = array<i64: 128, 128>}, {pipeline_mode = #tpu.pipeline_mode<synchronous>, transform_indices = @transform_4, window_bounds = array<i64: 1, 128>}, {transform_indices = @transform_5, window_bounds = array<i64: 16, 128>}]} {
    %c0 = arith.constant 0 : index
    %c0_0 = arith.constant 0 : index
    %0 = vector.load %arg1[%c0, %c0_0] : memref<16x784xf32, #tpu.memory_space<vmem>>, vector<16x784xf32>
    %1 = arith.truncf %0 : vector<16x784xf32> to vector<16x784xbf16>
    %c0_1 = arith.constant 0 : index
    %c0_2 = arith.constant 0 : index
    %2 = vector.load %arg2[%c0_1, %c0_2] : memref<784x128xbf16, #tpu.memory_space<vmem>>, vector<784x128xbf16>
    %cst = arith.constant dense<0.000000e+00> : vector<16x128xf32>
    %3 = tpu.matmul %1, %2, %cst {dimension_numbers = #tpu.dot_dimension_numbers<[1], [0], [0], [1], [0, 0, 1, 1], [], []>} : vector<16x784xbf16>, vector<784x128xbf16>, vector<16x128xf32> -> vector<16x128xf32>
    %c0_3 = arith.constant 0 : index
    %c0_4 = arith.constant 0 : index
    %4 = vector.load %arg3[%c0_3, %c0_4] : memref<1x128xf32, #tpu.memory_space<vmem>>, vector<1x128xf32>
    %5 = vector.broadcast %4 : vector<1x128xf32> to vector<16x128xf32>
    %6 = arith.addf %3, %5 : vector<16x128xf32>
    %cst_5 = arith.constant 0.000000e+00 : f32
    %7 = vector.broadcast %cst_5 : f32 to vector<16x128xf32>
    %8 = arith.maximumf %6, %7 : vector<16x128xf32>
    %9 = arith.truncf %8 : vector<16x128xf32> to vector<16x128xbf16>
    %c0_6 = arith.constant 0 : index
    %c0_7 = arith.constant 0 : index
    %10 = vector.load %arg4[%c0_6, %c0_7] : memref<128x128xbf16, #tpu.memory_space<vmem>>, vector<128x128xbf16>
    %cst_8 = arith.constant dense<0.000000e+00> : vector<16x128xf32>
    %11 = tpu.matmul %9, %10, %cst_8 {dimension_numbers = #tpu.dot_dimension_numbers<[1], [0], [0], [1], [0, 0, 1, 1], [], []>} : vector<16x128xbf16>, vector<128x128xbf16>, vector<16x128xf32> -> vector<16x128xf32>
    %c0_9 = arith.constant 0 : index
    %c0_10 = arith.constant 0 : index
    %12 = vector.load %arg5[%c0_9, %c0_10] : memref<1x128xf32, #tpu.memory_space<vmem>>, vector<1x128xf32>
    %13 = vector.broadcast %12 : vector<1x128xf32> to vector<16x128xf32>
    %14 = arith.addf %11, %13 : vector<16x128xf32>
    %15 = arith.truncf %14 : vector<16x128xf32> to vector<16x128xbf16>
    %c0_11 = arith.constant 0 : index
    %c0_12 = arith.constant 0 : index
    %16 = vector.load %arg6[%c0_11, %c0_12] : memref<16x128xbf16, #tpu.memory_space<vmem>>, vector<16x128xbf16>
    tpu.vector_store %arg6[%c0_11, %c0_12], %15 {strides = array<i32>} : memref<16x128xbf16, #tpu.memory_space<vmem>>, vector<16x128xbf16>,
    return
  }
  func.func @transform_0(%arg0: i32) -> (i32, i32) {
    %c0_i32 = arith.constant 0 : i32
    %c0_i32_0 = arith.constant 0 : i32
    return %arg0, %c0_i32 : i32, i32
  }
  func.func @transform_1(%arg0: i32) -> (i32, i32) {
    %c0_i32 = arith.constant 0 : i32
    %c0_i32_0 = arith.constant 0 : i32
    %c0_i32_1 = arith.constant 0 : i32
    return %c0_i32, %c0_i32_0 : i32, i32
  }
  func.func @transform_2(%arg0: i32) -> (i32, i32) {
    %c0_i32 = arith.constant 0 : i32
    %c0_i32_0 = arith.constant 0 : i32
    %c0_i32_1 = arith.constant 0 : i32
    return %c0_i32, %c0_i32_0 : i32, i32
  }
  func.func @transform_3(%arg0: i32) -> (i32, i32) {
    %c0_i32 = arith.constant 0 : i32
    %c0_i32_0 = arith.constant 0 : i32
    %c0_i32_1 = arith.constant 0 : i32
    return %c0_i32, %c0_i32_0 : i32, i32
  }
  func.func @transform_4(%arg0: i32) -> (i32, i32) {
    %c0_i32 = arith.constant 0 : i32
    %c0_i32_0 = arith.constant 0 : i32
    %c0_i32_1 = arith.constant 0 : i32
    return %c0_i32, %c0_i32_0 : i32, i32
  }
  func.func @transform_5(%arg0: i32) -> (i32, i32) {
    %c0_i32 = arith.constant 0 : i32
    %c0_i32_0 = arith.constant 0 : i32
    return %arg0, %c0_i32 : i32, i32
  }
}

</mosaic_0001>

<bundles_post_ra>
// kernel: mlp_forward.1
= control target key start
LH: loop header
LB: loop body
LE: loop exit
PB: predicated region body
PF: predicated region fallthrough
CT: control target
= control target key end

     0   :  { %vm438_vm0 = vcmask 130048   ;;  %s1215_s0 = inlined_call_operand.vmem [shape: f32[8,784], index: 0, kind: input, shape index: {}]   ;;  %s1216_s1 = inlined_call_operand.vmem [shape: bf16[784,128], index: 1, kind: input, shape index: {}]   ;;  %s1217_s2 = inlined_call_operand.vmem [shape: f32[1,128], index: 2, kind: input, shape index: {}]   ;;  %s1218_s3 = inlined_call_operand.vmem [shape: bf16[128,128], index: 3, kind: input, shape index: {}]   ;;  %s1219_s4 = inlined_call_operand.vmem [shape: f32[1,128], index: 4, kind: input, shape index: {}]   ;;  %s1220_s5 = inlined_call_operand.vmem [shape: bf16[8,128], index: 5, kind: output, shape index: {}]  }
   0x1   :  { %v906_v0 = vld [vmem:[%s1216_s1 + $0x38] sm:$0xff]  ;;  %v905_v4 = vld [vmem:[%s1216_s1 + $0x30] sm:$0xff]  ;;  %v904_v8 = vld [vmem:[%s1216_s1 + $0x28] sm:$0xff] }
   0x2   :  { %v914_v1 = vld [vmem:[%s1216_s1 + $0x78] sm:$0xff]  ;;  %442 = vmatpush.bf16.msra.mxu0 %v906_v0  ;;  %v913_v5 = vld [vmem:[%s1216_s1 + $0x70] sm:$0xff]  ;;  %v912_v9 = vld [vmem:[%s1216_s1 + $0x68] sm:$0xff] }
   0x3   :  { %v922_v2 = vld [vmem:[%s1216_s1 + $0xb8] sm:$0xff]  ;;  %456 = vmatpush.bf16.msra.mxu1 %v914_v1  ;;  %v921_v6 = vld [vmem:[%s1216_s1 + $0xb0] sm:$0xff]  ;;  %v920_v10 = vld [vmem:[%s1216_s1 + $0xa8] sm:$0xff] }
   0x4   :  { %v930_v3 = vld [vmem:[%s1216_s1 + $0xf8] sm:$0xff]  ;;  %470 = vmatpush.bf16.msra.mxu2 %v922_v2  ;;  %v929_v7 = vld [vmem:[%s1216_s1 + $0xf0] sm:$0xff]  ;;  %v928_v11 = vld [vmem:[%s1216_s1 + $0xe8] sm:$0xff] }
   0x5   :  { %484 = vmatpush.bf16.msra.mxu3 %v930_v3  ;;  %v903_v12 = vld [vmem:[%s1216_s1 + $0x20] sm:$0xff]  ;;  %v902_v16 = vld [vmem:[%s1216_s1 + $0x18] sm:$0xff]  ;;  %v901_v20 = vld [vmem:[%s1216_s1 + $0x10] sm:$0xff] }
   0x6   :  { %443 = vmatpush.bf16.msra.mxu0 %v905_v4  ;;  %v911_v13 = vld [vmem:[%s1216_s1 + $0x60] sm:$0xff]  ;;  %v910_v17 = vld [vmem:[%s1216_s1 + $0x58] sm:$0xff]  ;;  %v909_v21 = vld [vmem:[%s1216_s1 + $0x50] sm:$0xff] }
   0x7   :  { %457 = vmatpush.bf16.msra.mxu1 %v913_v5  ;;  %v919_v14 = vld [vmem:[%s1216_s1 + $0xa0] sm:$0xff]  ;;  %v918_v18 = vld [vmem:[%s1216_s1 + $0x98] sm:$0xff]  ;;  %v917_v22 = vld [vmem:[%s1216_s1 + $0x90] sm:$0xff] }
   0x8   :  { %471 = vmatpush.bf16.msra.mxu2 %v921_v6  ;;  %v927_v15 = vld [vmem:[%s1216_s1 + $0xe0] sm:$0xff]  ;;  %v926_v19 = vld [vmem:[%s1216_s1 + $0xd8] sm:$0xff]  ;;  %v925_v23 = vld [vmem:[%s1216_s1 + $0xd0] sm:$0xff] }
   0x9   :  { %485 = vmatpush.bf16.msra.mxu3 %v929_v7  ;;  %v900_v24 = vld [vmem:[%s1216_s1 + $0x8] sm:$0xff]  ;;  %v899_v28 = vld [vmem:[%s1216_s1] sm:$0xff]  ;;  %v28_v31 = vld [vmem:[%s1215_s0 + $0x38] sm:$0xff] }
   0xa   :  { %444 = vmatpush.bf16.msra.mxu0 %v904_v8  ;;  %v908_v25 = vld [vmem:[%s1216_s1 + $0x48] sm:$0xff]  ;;  %v907_v29 = vld [vmem:[%s1216_s1 + $0x40] sm:$0xff]  ;;  %v938_v34 = vld [vmem:[%s1216_s1 + $0x138] sm:$0xff] }
   0xb   :  { %458 = vmatpush.bf16.msra.mxu1 %v912_v9  ;;  %v916_v26 = vld [vmem:[%s1216_s1 + $0x88] sm:$0xff]  ;;  %v21_v30 = vld [vmem:[%s1215_s0] sm:$0xff]  ;;  %v946_v35 = vld [vmem:[%s1216_s1 + $0x178] sm:$0xff] }
   0xc   :  { %472 = vmatpush.bf16.msra.mxu2 %v920_v10  ;;  %v924_v27 = vld [vmem:[%s1216_s1 + $0xc8] sm:$0xff]  ;;  %v29_v33 = vld [vmem:[%s1215_s0 + $0x40] sm:$0xff]  ;;  %v23_v38 = vld [vmem:[%s1215_s0 + $0x10] sm:$0xff]  ;;  %v35_v40 = vpack.c.bf16 %v28_v31, %v21_v30 }
   0xd   :  { %486 = vmatpush.bf16.msra.mxu3 %v928_v11  ;;  %v22_v32 = vld [vmem:[%s1215_s0 + $0x8] sm:$0xff]  ;;  %v915_v36 = vld [vmem:[%s1216_s1 + $0x80] sm:$0xff]  ;;  %v24_v41 = vld [vmem:[%s1215_s0 + $0x18] sm:$0xff] }
   0xe   :  { %445 = vmatpush.bf16.msra.mxu0 %v903_v12  ;;  %v923_v37 = vld [vmem:[%s1216_s1 + $0xc0] sm:$0xff]  ;;  %v30_v39 = vld [vmem:[%s1215_s0 + $0x48] sm:$0xff]  ;;  %v31_v42 = vld [vmem:[%s1215_s0 + $0x50] sm:$0xff]  ;;  %v36_v43 = vpack.c.bf16 %v29_v33, %v22_v32 }
   0xf   :  { %459 = vmatpush.bf16.msra.mxu1 %v911_v13  ;;  %v947_v44 = vld [vmem:[%s1216_s1 + $0x180] sm:$0xff]  ;;  %v937_v45 = vld [vmem:[%s1216_s1 + $0x130] sm:$0xff]  ;;  %v37_v47 = vpack.c.bf16 %v30_v39, %v23_v38  ;;  %v38_v48 = vpack.c.bf16 %v31_v42, %v24_v41  ;;  %v936_v49 = vld [vmem:[%s1216_s1 + $0x128] sm:$0xff] }
  0x10   :  { %473 = vmatpush.bf16.msra.mxu2 %v919_v14  ;;  %v945_v46 = vld [vmem:[%s1216_s1 + $0x170] sm:$0xff]  ;;  %v944_v50 = vld [vmem:[%s1216_s1 + $0x168] sm:$0xff]  ;;  %v935_v51 = vld [vmem:[%s1216_s1 + $0x120] sm:$0xff] }
  0x11   :  { %487 = vmatpush.bf16.msra.mxu3 %v927_v15  ;;  %v943_v52 = vld [vmem:[%s1216_s1 + $0x160] sm:$0xff]  ;;  %v934_v53 = vld [vmem:[%s1216_s1 + $0x118] sm:$0xff]  ;;  %v27_v55 = vld [vmem:[%s1215_s0 + $0x30] sm:$0xff] }
  0x12   :  { %446 = vmatpush.bf16.msra.mxu0 %v902_v16  ;;  %v942_v54 = vld [vmem:[%s1216_s1 + $0x158] sm:$0xff]  ;;  %v34_v56 = vld [vmem:[%s1215_s0 + $0x68] sm:$0xff]  ;;  %v933_v57 = vld [vmem:[%s1216_s1 + $0x110] sm:$0xff] }
  0x13   :  { %460 = vmatpush.bf16.msra.mxu1 %v910_v17  ;;  %v941_v58 = vld [vmem:[%s1216_s1 + $0x150] sm:$0xff]  ;;  %v41_v59 = vpack.c.bf16 %v34_v56, %v27_v55  ;;  %v932_v60 = vld [vmem:[%s1216_s1 + $0x108] sm:$0xff]  ;;  %v931_v62 = vld [vmem:[%s1216_s1 + $0x100] sm:$0xff] }
  0x14   :  { %474 = vmatpush.bf16.msra.mxu2 %v918_v18  ;;  %v940_v61 = vld [vmem:[%s1216_s1 + $0x148] sm:$0xff]  ;;  %v939_v63 = vld [vmem:[%s1216_s1 + $0x140] sm:$0xff]  ;;  %v32_v1 = vld [vmem:[%s1215_s0 + $0x58] sm:$0xff] }
  0x15   :  { %488 = vmatpush.bf16.msra.mxu3 %v926_v19  ;;  %v25_v0 = vld [vmem:[%s1215_s0 + $0x20] sm:$0xff]  ;;  %v26_v2 = vld [vmem:[%s1215_s0 + $0x28] sm:$0xff]  ;;  %v955_v6 = vld [vmem:[%s1218_s3 + $0x38] sm:$0xff] }
  0x16   :  { %447 = vmatpush.bf16.msra.mxu0 %v901_v20  ;;  %v33_v3 = vld [vmem:[%s1215_s0 + $0x60] sm:$0xff]  ;;  %v39_v4 = vpack.c.bf16 %v32_v1, %v25_v0  ;;  %v954_v7 = vld [vmem:[%s1218_s3 + $0x30] sm:$0xff]  ;;  %v953_v8 = vld [vmem:[%s1218_s3 + $0x28] sm:$0xff] }
  0x17   :  { %461 = vmatpush.bf16.msra.mxu1 %v909_v21  ;;  %v40_v5 = vpack.c.bf16 %v33_v3, %v26_v2  ;;  %v952_v9 = vld [vmem:[%s1218_s3 + $0x20] sm:$0xff]  ;;  %v951_v10 = vld [vmem:[%s1218_s3 + $0x18] sm:$0xff]  ;;  %v950_v11 = vld [vmem:[%s1218_s3 + $0x10] sm:$0xff] }
  0x18   :  { %475 = vmatpush.bf16.msra.mxu2 %v917_v22  ;;  %v949_v12 = vld [vmem:[%s1218_s3 + $0x8] sm:$0xff]  ;;  %v948_v16 = vld [vmem:[%s1218_s3] sm:$0xff] }
  0x19   :  { %489 = vmatpush.bf16.msra.mxu3 %v925_v23  ;;  %v961_v17 = vld [vmem:[%s1217_s2] ss:$0 sm:$0xff] }
  0x1a   :  { %448 = vmatpush.bf16.msra.mxu0 %v900_v24 }
  0x1b   :  { %462 = vmatpush.bf16.msra.mxu1 %v908_v25 }
  0x1c   :  { %476 = vmatpush.bf16.msra.mxu2 %v916_v26 }
  0x1d   :  { %490 = vmatpush.bf16.msra.mxu3 %v924_v27 }
  0x1e   :  { %449 = vmatpush.bf16.msra.mxu0 %v899_v28 }
  0x1f   :  { %463 = vmatpush.bf16.msra.mxu1 %v907_v29 }
  0x20   :  { %477 = vmatpush.bf16.msra.mxu2 %v915_v36 }
  0x21   :  { %491 = vmatpush.bf16.msra.mxu3 %v923_v37  ;;  %450 = vmatmul.bf16.vlgmr.msra.gmra.mxu0 %v35_v40 }
  0x22   :  { %498 = vmatpush.bf16.msrb.mxu0 %v938_v34  ;;  %464 = vmatmul.bf16.vlgmr.msra.gmra.mxu1 %v36_v43 }
  0x23   :  { %512 = vmatpush.bf16.msrb.mxu1 %v946_v35  ;;  %478 = vmatmul.bf16.vlgmr.msra.gmra.mxu2 %v37_v47  ;;  %v962_v47 = vld [vmem:[%s1219_s4] ss:$0 sm:$0xff] }
  0x24   :  { %533 = vmatpush.bf16.msrb.mxu2 %v947_v44  ;;  %492 = vmatmul.bf16.vlgmr.msra.gmra.mxu3 %v38_v48 }
  0x25   :  { %611 = vmatpush.bf16.msrb.mxu3 %v955_v6 }
  0x26   :  { %499 = vmatpush.bf16.msrb.mxu0 %v937_v45 }
  0x27   :  { %513 = vmatpush.bf16.msrb.mxu1 %v945_v46 }
  0x29   :  { %612 = vmatpush.bf16.msrb.mxu3 %v954_v7 }
  0x2a   :  { %500 = vmatpush.bf16.msrb.mxu0 %v936_v49 }
  0x2b   :  { %514 = vmatpush.bf16.msrb.mxu1 %v944_v50 }
  0x2d   :  { %613 = vmatpush.bf16.msrb.mxu3 %v953_v8 }
  0x2e   :  { %501 = vmatpush.bf16.msrb.mxu0 %v935_v51 }
  0x2f   :  { %515 = vmatpush.bf16.msrb.mxu1 %v943_v52 }
  0x31   :  { %614 = vmatpush.bf16.msrb.mxu3 %v952_v9 }
  0x32   :  { %502 = vmatpush.bf16.msrb.mxu0 %v934_v53 }
  0x33   :  { %516 = vmatpush.bf16.msrb.mxu1 %v942_v54  ;;  %866 = vmatmul.msk.bf16.vlgmr.msrb.gmra.mxu2 %vm438_vm0, %v41_v59 }
  0x35   :  { %615 = vmatpush.bf16.msrb.mxu3 %v951_v10 }
  0x36   :  { %503 = vmatpush.bf16.msrb.mxu0 %v933_v57 }
  0x37   :  { %517 = vmatpush.bf16.msrb.mxu1 %v941_v58 }
  0x39   :  { %616 = vmatpush.bf16.msrb.mxu3 %v950_v11 }
  0x3a   :  { %504 = vmatpush.bf16.msrb.mxu0 %v932_v60 }
  0x3b   :  { %518 = vmatpush.bf16.msrb.mxu1 %v940_v61 }
  0x3d   :  { %617 = vmatpush.bf16.msrb.mxu3 %v949_v12 }
  0x3e   :  { %505 = vmatpush.bf16.msrb.mxu0 %v931_v62 }
  0x3f   :  { %519 = vmatpush.bf16.msrb.mxu1 %v939_v63 }
  0x41   :  { %506 = vmatmul.bf16.vlgmr.msrb.gmra.mxu0 %v39_v4  ;;  %618 = vmatpush.bf16.msrb.mxu3 %v948_v16 }
  0x42   :  { %520 = vmatmul.bf16.vlgmr.msrb.gmra.mxu1 %v40_v5 }
  0x9e   :  { %v451_v13 = vpop.f32.mrf.mxu0 }
  0x9f   :  { %v465_v14 = vpop.f32.mrf.mxu1  ;;  %v452_v18 = vadd.f32 %v961_v17, %v451_v13 }
  0xa1   :  { %v466_v22 = vadd.f32 %v465_v14, %v452_v18 }
  0xa6   :  { %v479_v15 = vpop.f32.mrf.mxu2  ;;  %v453_v19 = vpop.f32.mrf.mxu0 }
  0xa7   :  { %v467_v20 = vpop.f32.mrf.mxu1  ;;  %v493_v23 = vpop.f32.mrf.mxu3  ;;  %v454_v24 = vadd.f32 %v961_v17, %v453_v19  ;;  %v480_v25 = vadd.f32 %v479_v15, %v466_v22 }
  0xa9   :  { %v468_v26 = vadd.f32 %v467_v20, %v454_v24  ;;  %v494_v29 = vadd.f32 %v493_v23, %v480_v25 }
  0xae   :  { %v481_v21 = vpop.f32.mrf.mxu2 }
  0xaf   :  { %v482_v31 = vadd.f32 %v481_v21, %v468_v26  ;;  %v495_v33 = vpop.f32.mrf.mxu3 }
  0xb1   :  { %v496_v34 = vadd.f32 %v495_v33, %v482_v31 }
  0xb6   :  { %v535_v30 = vpop.f32.mrf.mxu2 }
  0xbe   :  { %v507_v27 = vpop.f32.mrf.mxu0  ;;  %v537_v41 = vpop.f32.mrf.mxu2 }
  0xbf   :  { %v521_v28 = vpop.f32.mrf.mxu1  ;;  %v508_v32 = vadd.f32 %v507_v27, %v494_v29 }
  0xc1   :  { %v522_v35 = vadd.f32 %v521_v28, %v508_v32 }
  0xc3   :  { %v536_v39 = vadd.f32 %v535_v30, %v522_v35 }
  0xc5   :  { %v540_v43 = vmax.f32 %v536_v39, 0.0 }
  0xc6   :  { %v509_v36 = vpop.f32.mrf.mxu0 }
  0xc7   :  { %v510_v37 = vadd.f32 %v509_v36, %v496_v34  ;;  %v523_v38 = vpop.f32.mrf.mxu1 }
  0xc9   :  { %v524_v40 = vadd.f32 %v523_v38, %v510_v37 }
  0xcb   :  { %v538_v42 = vadd.f32 %v537_v41, %v524_v40 }
  0xcd   :  { %v541_v44 = vmax.f32 %v538_v42, 0.0 }
  0xcf   :  { %v542_v45 = vpack.c.bf16 %v541_v44, %v540_v43 }
  0xd1   :  { %619 = vmatmul.bf16.vlgmr.msrb.gmra.mxu3 %v542_v45 }
 0x154   :  { %v620_v46 = vpop.f32.mrf.mxu3 }
 0x155   :  { %v621_v49 = vadd.f32 %v962_v47, %v620_v46 }
 0x15c   :  { %v622_v48 = vpop.f32.mrf.mxu3 }
 0x15d   :  { %v623_v50 = vadd.f32 %v962_v47, %v622_v48 }
 0x15f   :  { %v959_v51 = vpack.c.bf16 %v623_v50, %v621_v49 }
 0x161   :  { %960 = vst [vmem:[#allocation2] sm:$0xff] %v959_v51  }
 0x168   :  { %v647_v52 = vld [vmem:[#allocation2] sm:$0xf] }
 0x169   :  { %648 = vst [vmem:[%s1220_s5] sm:$0xf] %v647_v52 }

</bundles_post_ra>
